<compile_context>
chip_gen: v5e
topology: v5e:2x2
jax: 0.10.0
libtpu: 0.0.40
codegen_flags: <defaults>
</compile_context>

<pallas_src>
import jax
import jax.numpy as jnp
from jax.experimental import pallas as pl
from jax.experimental.pallas import tpu as pltpu


def se_block_kernel(x_ref, w1_ref, w2_ref, o_ref):
    # x_ref:  (TB, C)  batch tile (batch on sublanes, channels on the 128-lane axis)
    # w1_ref: (H, C)   fc1.weight, torch layout (lane-dense, resident across grid)
    # w2_ref: (H, C)   fc2.weight, PRE-TRANSPOSED in wrapper (lane-dense, resident)
    x = x_ref[...]            # native dtype (f32 or bf16)

    # fc1 + ReLU: contract x's channel dim with w1's channel dim -> (TB, H).
    # MXU matmul, operands stay native dtype, f32 accumulation.
    h = jax.lax.dot_general(
        x, w1_ref[...],
        dimension_numbers=(((1,), (1,)), ((), ())),
        preferred_element_type=jnp.float32,
    )
    h = jnp.maximum(h, 0.0).astype(x.dtype)   # bf16 path stays bf16; f32 stays f32

    # fc2 + sigmoid: contract h's hidden dim with w2_hc's hidden dim -> (TB, C).
    logits = jax.lax.dot_general(
        h, w2_ref[...],
        dimension_numbers=(((1,), (0,)), ((), ())),
        preferred_element_type=jnp.float32,
    )
    gate = jax.nn.sigmoid(logits)             # EUP; f32 gate

    # channel re-weighting
    o_ref[...] = (x * gate).astype(o_ref.dtype)


def _round_up(n, m):
    return ((n + m - 1) // m) * m


def _sublane_multiple(dtype):
    """Native sublane packing: 8 for 32-bit, 16 for 16-bit, 32 for 8-bit dtypes."""
    bits = jnp.dtype(dtype).itemsize * 8
    return max(8, 256 // bits)


def se_block(x, w1, w2, *, batch_tile=1024):
    """SEBlock forward.

    x : (B, C)
    w1: (C//r, C)  -- torch fc1.weight layout
    w2: (C, C//r)  -- torch fc2.weight layout (transposed once here, outside the hot loop)
    """
    B, C = x.shape
    H, C1 = w1.shape
    assert C1 == C and w2.shape == (C, H), "weight shapes must match torch Linear layout"

    sub = _sublane_multiple(x.dtype)

    # Number of grid steps: enough to respect batch_tile, and at least 2 when
    # the batch is splittable so the "parallel" axis keeps both v7x TCs busy.
    n_steps = pl.cdiv(B, batch_tile)
    if n_steps < 2 and B > sub:
        n_steps = 2
    tile = _round_up(pl.cdiv(B, n_steps), sub)
    grid_steps = pl.cdiv(B, tile)             # ragged last block handled by Pallas masking

    # One-time (~4 KiB) transpose so the resident fc2 weight is lane-dense (H, C).
    w2_hc = jnp.transpose(w2)

    x_bytes = jnp.dtype(x.dtype).itemsize
    w_bytes = jnp.dtype(w1.dtype).itemsize
    # Real VMEM budget: x + out tiles, double-buffered, plus resident weights; 2x headroom.
    vmem_need = 2 * 2 * tile * C * x_bytes + 2 * H * C * w_bytes
    vmem_limit = int(min(max(2 * vmem_need, 8 << 20), 32 << 20))

    cost = pl.CostEstimate(
        flops=2 * 2 * B * C * H,                                  # two small matmuls
        transcendentals=B * C,                                    # sigmoid
        bytes_accessed=2 * B * C * x_bytes + 2 * H * C * w_bytes, # x in + out + weights
    )

    return pl.pallas_call(
        se_block_kernel,
        out_shape=jax.ShapeDtypeStruct((B, C), x.dtype),
        grid=(grid_steps,),
        in_specs=[
            pl.BlockSpec((tile, C), lambda i: (i, 0)),  # x tile over batch
            pl.BlockSpec((H, C), lambda i: (0, 0)),     # fc1.weight, resident, lane-dense
            pl.BlockSpec((H, C), lambda i: (0, 0)),     # fc2.weight.T, resident, lane-dense
        ],
        out_specs=pl.BlockSpec((tile, C), lambda i: (i, 0)),
        compiler_params=pltpu.CompilerParams(
            dimension_semantics=("parallel",),          # shards batch across TCs (v7x)
            vmem_limit_bytes=vmem_limit,
        ),
        cost_estimate=cost,
    )(x, w1, w2_hc)


def se_block_ref(x, w1, w2):
    """Pure-JAX reference matching the PyTorch module."""
    h = jax.nn.relu(x @ w1.T)
    w = jax.nn.sigmoid(h @ w2.T)
    return x * w


if __name__ == "__main__":
    B, C, reduction = 40, 128, 16     # B deliberately not tile-aligned
    H = C // reduction                # 8

    key = jax.random.PRNGKey(0)
    kx, k1, k2 = jax.random.split(key, 3)

    x = jax.random.normal(kx, (B, C), dtype=jnp.float32)
    # deterministic Kaiming-uniform-like init (same shapes as nn.Linear weights)
    bound1 = 1.0 / (C ** 0.5)
    bound2 = 1.0 / (H ** 0.5)
    w1 = jax.random.uniform(k1, (H, C), minval=-bound1, maxval=bound1,
                            dtype=jnp.float32)   # fc1.weight: (C//r, C)
    w2 = jax.random.uniform(k2, (C, H), minval=-bound2, maxval=bound2,
                            dtype=jnp.float32)   # fc2.weight: (C, C//r)

    ref = se_block_ref(x, w1, w2)

    # Default path: 2-step grid (megacore-friendly), ragged last block, no pad/slice.
    out_default = jax.block_until_ready(se_block(x, w1, w2))
    assert out_default.shape == (B, C)
    assert jnp.allclose(out_default, ref, atol=1e-5, rtol=1e-5)

    # Small-tile path: multi-step grid with a masked ragged final block.
    out_tiled = jax.block_until_ready(se_block(x, w1, w2, batch_tile=16))
    assert out_tiled.shape == (B, C)
    assert jnp.allclose(out_tiled, ref, atol=1e-5, rtol=1e-5)

    # bf16 path: 16-sublane-aligned tiles, bf16 MXU operands with f32 accumulation.
    xb = x.astype(jnp.bfloat16)
    w1b = w1.astype(jnp.bfloat16)
    w2b = w2.astype(jnp.bfloat16)
    ref_b = se_block_ref(xb.astype(jnp.float32), w1b.astype(jnp.float32),
                         w2b.astype(jnp.float32))
    out_b = jax.block_until_ready(se_block(xb, w1b, w2b))
    assert out_b.shape == (B, C)
    assert jnp.allclose(out_b.astype(jnp.float32), ref_b, atol=3e-2, rtol=3e-2)

    print("KERNEL_OK")
</pallas_src>

<mosaic_0001>
module attributes {stable_mosaic.version = 11 : i64} {
  func.func @se_block_kernel(%arg0: i32, %arg1: memref<24x128xf32, #tpu.memory_space<vmem>>, %arg2: memref<8x128xf32, #tpu.memory_space<vmem>>, %arg3: memref<8x128xf32, #tpu.memory_space<vmem>>, %arg4: memref<24x128xf32, #tpu.memory_space<vmem>>) attributes {dimension_semantics = [#tpu.dimension_semantics<parallel>], iteration_bounds = array<i64: 2>, scalar_prefetch = 0 : i64, scratch_operands = 0 : i64, tpu.core_type = #tpu.core_type<tc>, window_params = [{transform_indices = @transform_0, window_bounds = array<i64: 24, 128>}, {pipeline_mode = #tpu.pipeline_mode<synchronous>, transform_indices = @transform_1, window_bounds = array<i64: 8, 128>}, {pipeline_mode = #tpu.pipeline_mode<synchronous>, transform_indices = @transform_2, window_bounds = array<i64: 8, 128>}, {transform_indices = @transform_3, window_bounds = array<i64: 24, 128>}]} {
    %c0 = arith.constant 0 : index
    %c0_0 = arith.constant 0 : index
    %0 = vector.load %arg1[%c0, %c0_0] : memref<24x128xf32, #tpu.memory_space<vmem>>, vector<24x128xf32>
    %c0_1 = arith.constant 0 : index
    %c0_2 = arith.constant 0 : index
    %1 = vector.load %arg2[%c0_1, %c0_2] : memref<8x128xf32, #tpu.memory_space<vmem>>, vector<8x128xf32>
    %cst = arith.constant dense<0.000000e+00> : vector<24x8xf32>
    %2 = tpu.matmul %0, %1, %cst {dimension_numbers = #tpu.dot_dimension_numbers<[1], [1], [0], [0], [0, 0, 1, 0], [], []>} : vector<24x128xf32>, vector<8x128xf32>, vector<24x8xf32> -> vector<24x8xf32>
    %cst_3 = arith.constant 0.000000e+00 : f32
    %3 = vector.broadcast %cst_3 : f32 to vector<24x8xf32>
    %4 = arith.maximumf %2, %3 : vector<24x8xf32>
    %c0_4 = arith.constant 0 : index
    %c0_5 = arith.constant 0 : index
    %5 = vector.load %arg3[%c0_4, %c0_5] : memref<8x128xf32, #tpu.memory_space<vmem>>, vector<8x128xf32>
    %cst_6 = arith.constant dense<0.000000e+00> : vector<24x128xf32>
    %6 = tpu.matmul %4, %5, %cst_6 {dimension_numbers = #tpu.dot_dimension_numbers<[1], [0], [0], [1], [0, 0, 1, 1], [], []>} : vector<24x8xf32>, vector<8x128xf32>, vector<24x128xf32> -> vector<24x128xf32>
    %7 = arith.negf %6 : vector<24x128xf32>
    %8 = math.exp %7 : vector<24x128xf32>
    %cst_7 = arith.constant 1.000000e+00 : f32
    %9 = vector.broadcast %cst_7 : f32 to vector<24x128xf32>
    %10 = arith.addf %9, %8 : vector<24x128xf32>
    %11 = arith.divf %9, %10 : vector<24x128xf32>
    %12 = arith.mulf %0, %11 : vector<24x128xf32>
    %c0_8 = arith.constant 0 : index
    %c0_9 = arith.constant 0 : index
    %13 = vector.load %arg4[%c0_8, %c0_9] : memref<24x128xf32, #tpu.memory_space<vmem>>, vector<24x128xf32>
    tpu.vector_store %arg4[%c0_8, %c0_9], %12 {strides = array<i32>} : memref<24x128xf32, #tpu.memory_space<vmem>>, vector<24x128xf32>,
    return
  }
  func.func @transform_0(%arg0: i32) -> (i32, i32) {
    %c0_i32 = arith.constant 0 : i32
    %c0_i32_0 = arith.constant 0 : i32
    return %arg0, %c0_i32 : i32, i32
  }
  func.func @transform_1(%arg0: i32) -> (i32, i32) {
    %c0_i32 = arith.constant 0 : i32
    %c0_i32_0 = arith.constant 0 : i32
    %c0_i32_1 = arith.constant 0 : i32
    return %c0_i32, %c0_i32_0 : i32, i32
  }
  func.func @transform_2(%arg0: i32) -> (i32, i32) {
    %c0_i32 = arith.constant 0 : i32
    %c0_i32_0 = arith.constant 0 : i32
    %c0_i32_1 = arith.constant 0 : i32
    return %c0_i32, %c0_i32_0 : i32, i32
  }
  func.func @transform_3(%arg0: i32) -> (i32, i32) {
    %c0_i32 = arith.constant 0 : i32
    %c0_i32_0 = arith.constant 0 : i32
    return %arg0, %c0_i32 : i32, i32
  }
}

</mosaic_0001>

<bundles_post_ra>
// kernel: tpu_custom_call.1
= control target key start
LH: loop header
LB: loop body
LE: loop exit
PB: predicated region body
PF: predicated region fallthrough
CT: control target
= control target key end

     0   :  { %8 = vsyncpa [#allocation3], 0  ;;  %s1022_s0 = inlined_call_operand.hbm [shape: f32[40,128], index: 0, kind: input, shape index: {}]   ;;  %s1023_s1 = inlined_call_operand.hbm [shape: f32[8,128], index: 1, kind: input, shape index: {}]   ;;  %s1024_s2 = inlined_call_operand.hbm [shape: f32[8,128], index: 2, kind: input, shape index: {}]   ;;  %s1025_s3 = inlined_call_operand.hbm [shape: f32[40,128], index: 3, kind: output, shape index: {}]  }
   0x1   :  { %10 = vsyncpa [#allocation3 + $0x1], 0 }
   0x2   :  { %11 = vsyncpa [#allocation6], 0 }
   0x3   :  { %12 = vsyncpa [#allocation4], 0 }
   0x4   :  { %14 = vsyncpa [#allocation4 + $0x1], 0  ;;  %s803_s12 = smov 0   ;;  %s805_s13 = smov 0  }
   0x5   :  { %s807_s14 = smov 0   ;;  %s809_s15 = smov 0  }
   0x6 LB: > { %s824_s16 = sadd.s32 4294967295, %s773_s15   ;;  %s485_s17 = sadd.s32 4294967294, %s773_s15   ;;  %s773_s15 = sphi %s809_s15, %s1042_s15   ;;  %s769_s14 = sphi %s807_s14, %s1041_s14   ;;  %s765_s13 = sphi %s805_s13, %s1040_s13   ;;  %s761_s12 = sphi %s803_s12, %s1039_s12  }
   0x7   : > { %s828_s18 = sadd.s32 1, %s773_s15   ;;  %s27_s19 = sadd.s32 1, %s769_s14 }
   0x8   : > { %s24_s20 = ssub.s32 %s773_s15, %s828_s18  ;;  %p34_p0 = scmp.ne.s32.totalorder %s769_s14, %s765_s13 }
   0x9   : > { %p25_p1 = scmp.eq.s32.totalorder %s24_s20, 0  ;;  %p35_p2 = scmp.eq.s32.totalorder %s773_s15, 0 }
   0xa   : > { %p40_p3 = scmp.ne.s32.totalorder %s765_s13, %s761_s12  ;;  %p1027_p4 = scmp.eq.s32.totalorder %s824_s16, 0 }
   0xb   : > { %s840_s21 = scalar_select %p25_p1, %s769_s14, %s27_s19  }
   0xc   : > { %p842_p5 = por %p35_p2, %p34_p0  ;;  %p848_p6 = por %p1027_p4, %p40_p3 }
   0xd   : > { %p106_p7 = scmp.eq.s32.totalorder %s824_s16, 1  ;;  %p112_p8 = scmp.eq.s32.totalorder %s485_s17, 1 }
   0xe   : > { %p486_p9 = scmp.ge.s32.totalorder %s773_s15, 1  ;;  %p119_p10 = scmp.lt.s32.totalorder %s773_s15, 3 }
   0xf   : > { %p855_p11 = por %p106_p7, %p34_p0  ;;  %p859_p12 = por %p112_p8, %p40_p3 }
  0x10   : > { %p863_p13 = pnand %p486_p9, %p119_p10  ;;  %s131_s29 = sshll.u32 %s1023_s1, 4  ;;  %s132_s29 = int_to_ptr.hbm [resolvable:$true] %s131_s29 }
  0x11   : > { %s1031_s25 = scalar_select %p859_p12, 1, 0 }
  0x12   : > { %p527_p1 = pneg %p863_p13  ;;  %s775_s30 = smov [#allocation5]  }
  0x13   : > { %s133_s4 = sshll.u32 %s775_s30, 4  ;;  %s143_s7 = sshll.u32 %s1024_s2, 4  ;;  %s134_s4 = int_to_ptr.vmem [resolvable:$true] %s133_s4  ;;  %s144_s7 = int_to_ptr.hbm [resolvable:$true] %s143_s7 }
  0x14   : > { %p528_p0 = pnand %p527_p1, %p1027_p4  ;;  %s776_s8 = smov [#allocation7]  }
  0x15   : > { %s145_s9 = sshll.u32 %s776_s8, 4  ;;  %p1026_p2 = scmp.ge.s32.totalorder %s773_s15, 2  ;;  %s146_s9 = int_to_ptr.vmem [resolvable:$true] %s145_s9 }
  0x16   : > { %530 = dma.hbm_to_vmem [thread:$0]  (!%p528_p0), %s132_s29, 128, %s134_s4, [#allocation6]  }
  0x17   : > { %533 = dma.hbm_to_vmem [thread:$0]  (!%p528_p0), %s144_s7, 128, %s146_s9, [#allocation6]  }
  0x18   : > { %152 = sbr.rel (%p1026_p2) target bundleno = 67 (0x43), region = 24 }
  0x1d   : > { %155 = sbr.rel (!%p842_p5) target bundleno = 67 (0x43), region = 28  ;;  %s156_s10 = sand.u32 (%p842_p5), 1, %s769_s14  }
  0x1e   : > { %s161_s11 = smul.u32 (%p842_p5), 3, %s773_s15  ;;  %s887_s29 = scalar_lea.sflag (%p842_p5), [#allocation3], %s156_s10 }
  0x1f   : > { %s515_s17 = smul.u32 (%p842_p5), 24, %s156_s10 }
  0x20   : > { %s162_s19 = ssub.s32 (%p842_p5), 5, %s161_s11 }
  0x21   : > { %p163_p3 = scmp.lt.s32.totalorder (%p842_p5), %s162_s19, 3  ;;  %s160_s30 = scalar_lea.vmem (%p842_p5), [#allocation2], %s515_s17 }
  0x23   : > { %s1044_s19 = smov (!%p163_p3, %s162_s19), 3 }
  0x24   : > { %s490_s20 = sshll.u32 %s1044_s19, 3 }
  0x25   : > { %s166_s27 = ssub.s32 24, %s490_s20 }
  0x26   : > { %s167_s28 = sshll.u32 %s166_s27, 4 }
  0x27   : > { %168 = vsyncadd %s887_s29, %s167_s28  ;;  %p890_p5 = scmp.ne.s32.totalorder %s490_s20, 0  ;;  %s511_s4 = smul.u32 24, %s773_s15 }
  0x28   : > { %s895_s5 = sshll.u32 %s160_s30, 4  ;;  %s494_s6 = sshll.u32 %s1044_s19, 7  ;;  %s176_s5 = int_to_ptr.vmem [resolvable:$true] %s895_s5 }
  0x29   : > { %s171_s9 = scalar_lea.hbm %s1022_s0, %s511_s4  ;;  %s655_s17 = sshrl.u32 %s494_s6, 4 }
  0x2a   : > { %s173_s10 = sshll.u32 %s171_s9, 4  ;;  %s664_s30 = scalar_lea.hbm %s1022_s0, 40  ;;  %s902_s10 = int_to_ptr.hbm [resolvable:$true] %s173_s10 }
  0x2b   : > { %s653_s11 = sshra.s32 %s902_s10, 4  ;;  %s654_s11 = int_to_ptr.hbm [resolvable:$true] %s653_s11 }
  0x2c   : > { %s660_s20 = scalar_lea.hbm %s654_s11, %s655_s17  ;;  %p665_p10 = scmp.lt.s32.totalorder %s654_s11, %s1022_s0 }
  0x2d   : > { %p661_p7 = scmp.ne.s32.totalorder %s654_s11, %s660_s20  ;;  %p666_p1 = scmp.lt.s32.totalorder %s664_s30, %s660_s20 }
  0x2f   : > { %p662_p8 = pnand %p661_p7, %p890_p5  ;;  %p667_p0 = por %p666_p1, %p665_p10 }
  0x31   : > { %p663_p9 = pneg %p662_p8 }
  0x33   : > { %p668_p3 = pnand %p667_p0, %p663_p9 }
  0x35   : > { %671 = shalt.err (!%p668_p3)
}
  0x36   : > { %s672_s8 = sshra.s32 %s176_s5, 4  ;;  %s777_s27 = smov [#allocation2]   ;;  %s673_s8 = int_to_ptr.vmem [resolvable:$true] %s672_s8 }
  0x37   : > { %s679_s9 = scalar_lea.vmem %s673_s8, %s655_s17  ;;  %s683_s28 = scalar_lea.vmem %s777_s27, 48 }
  0x38   : > { %p680_p7 = scmp.ne.s32.totalorder %s673_s8, %s679_s9  ;;  %p685_p4 = scmp.lt.s32.totalorder %s683_s28, %s679_s9 }
  0x3a   : > { %p681_p8 = pnand %p680_p7, %p890_p5 }
  0x3c   : > { %p682_p2 = pneg %p681_p8 }
  0x3e   : > { %p687_p12 = pnand %p685_p4, %p682_p2 }
  0x40   : > { %690 = shalt.err (!%p687_p12)
}
  0x41   : > { %s778_s11 = smov 128   ;;  %s779_s20 = smov 8  }
  0x42   : > { %181 = dma.hbm_to_vmem [thread:$0]  (%p890_p5), %s902_s10, %s494_s6, %s176_s5, %s887_s29, %s778_s11, %s778_s11, %s779_s20  }
  0x43 PF: > { %187 = sbr.rel (%p863_p13) target bundleno = 416 (0x1a0), region = 32  ;;  %s930_s17 = sand.u32 (!%p863_p13), 1, %s765_s13  }
  0x44   : > { %s516_s30 = smul.u32 (!%p863_p13), 24, %s930_s17  ;;  %s190_s7 = scalar_lea.sflag (!%p863_p13), [#allocation3], %s930_s17 }
  0x46   : > { %s193_s4 = scalar_lea.vmem (!%p863_p13), [#allocation2], %s516_s30 }
  0x48   : > { %748 = dma.done.wait (%p848_p6), %s190_s7, 384  }
  0x49   : > { %750 = vsyncadd (%p848_p6), %s190_s7, 4294966912  ;;  %p1034_p4 = scmp.eq.s32.totalorder %s824_s16, 0 }
  0x4b   : > { %752 = dma.done.wait (%p1034_p4), [#allocation6], 256   ;;  %p1035_p12 = pmov %p1034_p4 }
  0x4c   : > { %v240_v0 = vld [vmem:[#allocation5] sm:$0xff]  ;;  %v944_v1 = vld [vmem:[%s193_s4 + $0x8] sm:$0xff]  ;;  %v237_v2 = vld [vmem:[%s193_s4] sm:$0xff]  ;;  %vm271_vm0 = vcmask 64512   ;;  %s952_s23 = scalar_lea.vmem [#allocation8], %s516_s30  ;;  %s371_s26 = scalar_lea.sflag [#allocation4], %s930_s17 }
  0x4d   : > { %754 = vsyncadd (%p1035_p12), [#allocation6], 4294967040  ;;  %513 = vmatpush.xpose.msra.mxu2 %v240_v0  ;;  %256 = vmatpush.xpose.msra.mxu0 %v240_v0  ;;  %v947_v3 = vld [vmem:[%s193_s4 + $0x10] sm:$0xff]  ;;  %v270_v4 = vld [vmem:[#allocation7] sm:$0xff]  ;;  %s378_s19 = smul.u32 (%p855_p11), 3, %s824_s16 }
  0x4e   : > { %514 = vmatpush.msra.mxu3 %v270_v4  ;;  %296 = vmatpush.msra.mxu1 %v270_v4 }
  0x4f   : > { %s379_s29 = ssub.s32 (%p855_p11), 5, %s378_s19 }
  0x50   : > { %260 = vmatmul.f32.vlgmr.msra.gmra.mxu2 %v944_v1  ;;  %257 = vmatmul.f32.vlgmr.msra.gmra.mxu0 %v237_v2  ;;  %p380_p6 = scmp.lt.s32.totalorder (%p855_p11), %s379_s29, 3 }
  0x58   : > { %263 = vmatmul.f32.gmra.mxu2 %v947_v3 }
  0xcd   : > { %v258_v5 = vpop.f32.mrf.mxu0 }
  0xce   : > { %v267_v6 = vmax.f32 %v258_v5, 0.0 }
  0xd0   : > { %498 = vmatmul.msk.f32.vlgmr.msra.gmra.mxu1 %vm271_vm0, %v267_v6 }
  0xd3   : > { %v261_v7 = vpop.f32.mrf.mxu2 }
  0xd4   : > { %v268_v8 = vmax.f32 %v261_v7, 0.0 }
  0xd6   : > { %499 = vmatmul.msk.f32.vlgmr.msra.gmra.mxu3 %vm271_vm0, %v268_v8 }
  0xdb   : > { %v264_v9 = vpop.f32.mrf.mxu2 }
  0xdc   : > { %v269_v10 = vmax.f32 %v264_v9, 0.0 }
  0xde   : > { %500 = vmatmul.msk.f32.gmra.mxu3 %vm271_vm0, %v269_v10 }
 0x14d   : > { %v298_v11 = vpop.f32.mrf.mxu1 }
 0x14e   : > { %v501_v12 = vmul.f32 -1.442695, %v298_v11 }
 0x150   : > { %581 = vpow2.f32 %v501_v12 }
 0x156   : > { %v582_v13 = vpop.eup %581 }
 0x157   : > { %v316_v14 = vadd.f32 1.0, %v582_v13 }
 0x159   : > { %583 = vrcp.f32 %v316_v14  ;;  %v301_v15 = vpop.f32.mrf.mxu3  ;;  %vm324_vm1 = vweird.f32 %v316_v14  ;;  %v330_v19 = vand.u32 2147483648, %v316_v14  ;;  %v328_v23 = vand.u32 2147483647, %v316_v14 }
 0x15a   : > { %v502_v16 = vmul.f32 -1.442695, %v301_v15 }
 0x15b   : > { %v331_v27 = vor.u32 1.1754944e-38, %v330_v19  ;;  %vm329_vm4 = vcmp.eq.f32.partialorder %v328_v23, 8.507059e+37 }
 0x15c   : > { %585 = vpow2.f32 %v502_v16 }
 0x15f   : > { %v584_v17 = vpop.eup %583 }
 0x160   : > { %v320_v18 = vmul.f32 %v584_v17, %v316_v14  ;;  %vm325_vm2 = vweird.f32 %v584_v17 }
 0x161   : > { %v304_v20 = vpop.f32.mrf.mxu3  ;;  %vm326_vm3 = vmor %vm324_vm1, %vm325_vm2 }
 0x162   : > { %v586_v21 = vpop.eup %585  ;;  %v321_v22 = vsub.f32 1.0, %v320_v18  ;;  %v503_v24 = vmul.f32 -1.442695, %v304_v20 }
 0x163   : > { %v317_v25 = vadd.f32 1.0, %v586_v21 }
 0x164   : > { %v322_v26 = vmul.f32 %v584_v17, %v321_v22  ;;  %587 = vpow2.f32 %v503_v24 }
 0x165   : > { %589 = vrcp.f32 %v317_v25  ;;  %v345_v37 = vand.u32 2147483648, %v317_v25  ;;  %v343_v39 = vand.u32 2147483647, %v317_v25  ;;  %vm339_vm6 = vweird.f32 %v317_v25 }
 0x166   : > { %v323_v28 = vadd.f32 %v584_v17, %v322_v26 }
 0x167   : > { %v346_v42 = vor.u32 1.1754944e-38, %v345_v37  ;;  %vm344_vm8 = vcmp.eq.f32.partialorder %v343_v39, 8.507059e+37 }
 0x168   : > { %v327_v29 = vsel %vm326_vm3, %v584_v17, %v323_v28 }
 0x169   : > { %v332_v30 = vsel %vm329_vm4, %v331_v27, %v327_v29 }
 0x16a   : > { %v588_v31 = vpop.eup %587  ;;  %v364_v32 = vmul.f32 %v332_v30, %v237_v2 }
 0x16b   : > { %v590_v33 = vpop.eup %589  ;;  %v318_v34 = vadd.f32 1.0, %v588_v31 }
 0x16c   : > { %367 = vst [vmem:[%s952_s23] sm:$0xff] %v364_v32  ;;  %v335_v35 = vmul.f32 %v590_v33, %v317_v25  ;;  %vm340_vm5 = vweird.f32 %v590_v33 }
 0x16d   : > { %591 = vrcp.f32 %v318_v34  ;;  %vm341_vm7 = vmor %vm339_vm6, %vm340_vm5  ;;  %v360_v48 = vand.u32 2147483648, %v318_v34  ;;  %v358_v50 = vand.u32 2147483647, %v318_v34  ;;  %vm354_vm10 = vweird.f32 %v318_v34 }
 0x16e   : > { %v336_v36 = vsub.f32 1.0, %v335_v35 }
 0x16f   : > { %v361_v52 = vor.u32 1.1754944e-38, %v360_v48  ;;  %vm359_vm12 = vcmp.eq.f32.partialorder %v358_v50, 8.507059e+37 }
 0x170   : > { %v337_v38 = vmul.f32 %v590_v33, %v336_v36 }
 0x172   : > { %v338_v40 = vadd.f32 %v590_v33, %v337_v38 }
 0x173   : > { %v592_v41 = vpop.eup %591 }
 0x174   : > { %v342_v43 = vsel %vm341_vm7, %v590_v33, %v338_v40  ;;  %v350_v44 = vmul.f32 %v592_v41, %v318_v34  ;;  %vm355_vm9 = vweird.f32 %v592_v41 }
 0x175   : > { %v347_v45 = vsel %vm344_vm8, %v346_v42, %v342_v43  ;;  %vm356_vm11 = vmor %vm354_vm10, %vm355_vm9 }
 0x176   : > { %v365_v46 = vmul.f32 %v347_v45, %v944_v1  ;;  %v351_v47 = vsub.f32 1.0, %v350_v44 }
 0x178   : > { %368 = vst [vmem:[%s952_s23 + $0x8] sm:$0xff] %v365_v46  ;;  %v352_v49 = vmul.f32 %v592_v41, %v351_v47 }
 0x17a   : > { %v353_v51 = vadd.f32 %v592_v41, %v352_v49 }
 0x17c   : > { %v357_v53 = vsel %vm356_vm11, %v592_v41, %v353_v51  ;;  %377 = sbr.rel (!%p855_p11) target bundleno = 416 (0x1a0), region = 48 }
 0x17d   : > { %v362_v54 = vsel %vm359_vm12, %v361_v52, %v357_v53 }
 0x17e   : > { %v366_v55 = vmul.f32 %v362_v54, %v947_v3 }
 0x180   : > { %369 = vst [vmem:[%s952_s23 + $0x10] sm:$0xff] %v366_v55 }
 0x181   : > { %s1046_s29 = smov (!%p380_p6, %s379_s29), 3 }
 0x182   : > { %s504_s22 = sshll.u32 %s1046_s29, 3 }
 0x183   : > { %s383_s5 = ssub.s32 24, %s504_s22 }
 0x184   : > { %s384_s6 = sshll.u32 %s383_s5, 4 }
 0x185   : > { %385 = vsyncadd %s371_s26, %s384_s6  ;;  %p968_p13 = scmp.ne.s32.totalorder %s504_s22, 0  ;;  %s512_s10 = smul.u32 24, %s824_s16 }
 0x186   : > { %s390_s8 = sshll.u32 %s952_s23, 4  ;;  %s508_s9 = sshll.u32 %s1046_s29, 7  ;;  %s978_s8 = int_to_ptr.vmem [resolvable:$true] %s390_s8 }
 0x187   : > { %s388_s11 = scalar_lea.hbm %s1025_s3, %s512_s10  ;;  %s692_s30 = sshra.s32 %s978_s8, 4  ;;  %s693_s30 = int_to_ptr.vmem [resolvable:$true] %s692_s30 }
 0x188   : > { %s392_s20 = sshll.u32 %s388_s11, 4  ;;  %s694_s7 = sshrl.u32 %s508_s9, 4  ;;  %s980_s20 = int_to_ptr.hbm [resolvable:$true] %s392_s20 }
 0x189   : > { %s699_s4 = scalar_lea.vmem %s693_s30, %s694_s7  ;;  %s780_s16 = smov [#allocation8]  }
 0x18a   : > { %p700_p11 = scmp.ne.s32.totalorder %s693_s30, %s699_s4  ;;  %s703_s23 = scalar_lea.vmem %s780_s16, 48 }
 0x18b   : > { %p705_p9 = scmp.lt.s32.totalorder %s703_s23, %s699_s4 }
 0x18c   : > { %p701_p2 = pnand %p700_p11, %p968_p13 }
 0x18e   : > { %p702_p5 = pneg %p701_p2 }
 0x190   : > { %p707_p10 = pnand %p705_p9, %p702_p5 }
 0x192   : > { %710 = shalt.err (!%p707_p10)
}
 0x193   : > { %s711_s19 = sshra.s32 %s980_s20, 4  ;;  %s722_s10 = scalar_lea.hbm %s1025_s3, 40  ;;  %s712_s19 = int_to_ptr.hbm [resolvable:$true] %s711_s19 }
 0x194   : > { %s718_s22 = scalar_lea.hbm %s712_s19, %s694_s7  ;;  %p723_p7 = scmp.lt.s32.totalorder %s712_s19, %s1025_s3 }
 0x195   : > { %p719_p1 = scmp.ne.s32.totalorder %s712_s19, %s718_s22  ;;  %p724_p8 = scmp.lt.s32.totalorder %s722_s10, %s718_s22 }
 0x197   : > { %p720_p0 = pnand %p719_p1, %p968_p13  ;;  %p725_p4 = por %p724_p8, %p723_p7 }
 0x199   : > { %p721_p3 = pneg %p720_p0 }
 0x19b   : > { %p726_p12 = pnand %p725_p4, %p721_p3 }
 0x19d   : > { %729 = shalt.err (!%p726_p12)
}
 0x19e   : > { %s781_s11 = smov 128   ;;  %s782_s30 = smov 8  }
 0x19f   : > { %398 = dma.vmem_to_hbm [thread:$0]  (%p968_p13), %s978_s8, %s508_s9, %s980_s20, %s371_s26, %s781_s11, %s781_s11, %s782_s30  }
 0x1a0 PF: > { %s407_s7 = sand.u32 1, %s761_s12   ;;  %p1037_p6 = scmp.ne.s32.totalorder %s1031_s25, 0 }
 0x1a1   : > { %p1038_p11 = scmp.ge.s32.totalorder %s773_s15, 2  ;;  %s408_s4 = scalar_lea.sflag [#allocation4], %s407_s7 }
 0x1a3   : > { %p535_p2 = pnand %p1038_p11, %p1037_p6 }
 0x1a5   : > { %p536_p5 = pneg %p535_p2 }
 0x1a7   : > { %756 = dma.done.wait (%p536_p5), %s408_s4, 384  }
 0x1a8   : > { %758 = vsyncadd (%p536_p5), %s408_s4, 4294966912  ;;  %p17_p9 = scmp.ge.s32.totalorder %s828_s18, 4   ;;  %s1039_s12 = smov %s765_s13 }
 0x1a9   : > { %s1040_s13 = smov %s769_s14  ;;  %s1041_s14 = smov %s840_s21 }
 0x1aa   : > { %s1042_s15 = smov %s828_s18  ;;  %19 = sbr.rel (!%p17_p9) target bundleno = 6 (0x6), region = 85 }
 0x1af   :  { %414 = vsyncpa [#allocation3], 1 }
 0x1b0   :  { %416 = vsyncpa [#allocation3 + $0x1], 1 }
 0x1b1   :  { %417 = vsyncpa [#allocation6], 1 }
 0x1b2   :  { %418 = vsyncpa [#allocation4], 1 }
 0x1b3   :  { %420 = vsyncpa [#allocation4 + $0x1], 1 }

</bundles_post_ra>
